<compile_context>
chip_gen: v7x
topology: tpu7x:2x2x1
jax: 0.10.0
libtpu: 0.0.40
codegen_flags: <defaults>
</compile_context>

<pallas_src>
import math

import jax
import jax.numpy as jnp
from jax.experimental import pallas as pl
from jax.experimental.pallas import tpu as pltpu


def _round_up(x, m):
    return ((x + m - 1) // m) * m


def _critic_kernel(x_ref, u_ref,
                   w1x_ref, w1u_ref, b1_ref,
                   w2_ref, b2_ref,
                   w3_ref, b3_ref,
                   out_ref):
    # layer 1: fused concat via split weights, f32 accumulate, relu in f32
    h = jnp.dot(x_ref[...], w1x_ref[...], preferred_element_type=jnp.float32)
    h = h + jnp.dot(u_ref[...], w1u_ref[...], preferred_element_type=jnp.float32)
    h = jnp.maximum(h + b1_ref[...], 0.0)
    # layer 2
    h = jnp.dot(h.astype(w2_ref.dtype), w2_ref[...],
                preferred_element_type=jnp.float32)
    h = jnp.maximum(h + b2_ref[...], 0.0)
    # output head (lane-padded to 128 columns)
    q = jnp.dot(h.astype(w3_ref.dtype), w3_ref[...],
                preferred_element_type=jnp.float32)
    out_ref[...] = (q + b3_ref[...]).astype(out_ref.dtype)


def linear_critic_forward(x, u, params, *, block_b=256, use_bf16=True):
    """x: (B, state_dim) f32, u: (B, action_dim) f32 -> q: (B, 1) f32."""
    B, S = x.shape
    A = u.shape[1]
    H1 = params["w1"].shape[1]
    H2 = params["w2"].shape[1]
    OUT_PAD = 128                       # lane-dense output width

    mm_dtype = jnp.bfloat16 if use_bf16 else jnp.float32
    itemsize = 2 if use_bf16 else 4

    # ---- weights: (in, out) layout, matmul operands in bf16, biases f32 ----
    w1 = params["w1"].astype(mm_dtype)
    w1x, w1u = w1[:S], w1[S:]
    w2 = params["w2"].astype(mm_dtype)
    b1 = params["b1"].reshape(1, H1).astype(jnp.float32)
    b2 = params["b2"].reshape(1, H2).astype(jnp.float32)
    # zero-pad the 1-wide head to 128 lanes (kills masked partial stores)
    w3p = jnp.zeros((H2, OUT_PAD), mm_dtype).at[:, :1].set(
        params["w3"].astype(mm_dtype))
    b3p = jnp.zeros((1, OUT_PAD), jnp.float32).at[:, :1].set(
        params["b3"].reshape(1, 1).astype(jnp.float32))

    # ---- batch tiling: pad B to the sublane pack and the batch tile --------
    sub = 16 if use_bf16 else 8
    tb = max(sub, min(_round_up(block_b, sub), _round_up(B, sub)))
    Bp = _round_up(B, tb)
    if Bp != B:
        x = jnp.pad(x, ((0, Bp - B), (0, 0)))
        u = jnp.pad(u, ((0, Bp - B), (0, 0)))
    x = x.astype(mm_dtype)
    u = u.astype(mm_dtype)
    grid = (pl.cdiv(Bp, tb),)

    # ---- VMEM budget (explicit, v7x-safe) ----------------------------------
    weight_bytes = ((w1x.size + w1u.size + w2.size + w3p.size) * itemsize
                    + (b1.size + b2.size + b3p.size) * 4)
    stream_bytes = 2 * (tb * (S + A) * itemsize + tb * OUT_PAD * 4)  # dbl buf
    inter_bytes = tb * (H1 + H2) * 4
    vmem_limit = int(min(max(2 * (weight_bytes + stream_bytes + inter_bytes),
                             16 * 1024 * 1024), 64 * 1024 * 1024))

    cost = pl.CostEstimate(
        flops=2 * Bp * ((S + A) * H1 + H1 * H2 + H2 * OUT_PAD),
        transcendentals=0,
        bytes_accessed=(x.size + u.size) * itemsize + weight_bytes
        + Bp * OUT_PAD * 4)

    const_spec = lambda shape: pl.BlockSpec(shape, lambda i: (0, 0))

    out = pl.pallas_call(
        _critic_kernel,
        out_shape=jax.ShapeDtypeStruct((Bp, OUT_PAD), jnp.float32),
        grid=grid,
        in_specs=[
            pl.BlockSpec((tb, S), lambda i: (i, 0)),      # x tile (streamed)
            pl.BlockSpec((tb, A), lambda i: (i, 0)),      # u tile (streamed)
            const_spec((S, H1)),                          # w1x (resident)
            const_spec((A, H1)),                          # w1u
            const_spec((1, H1)),                          # b1
            const_spec((H1, H2)),                         # w2
            const_spec((1, H2)),                          # b2
            const_spec((H2, OUT_PAD)),                    # w3 (lane-padded)
            const_spec((1, OUT_PAD)),                     # b3 (lane-padded)
        ],
        out_specs=pl.BlockSpec((tb, OUT_PAD), lambda i: (i, 0)),
        compiler_params=pltpu.CompilerParams(
            dimension_semantics=("parallel",),
            vmem_limit_bytes=vmem_limit),
        cost_estimate=cost,
    )(x, u, w1x, w1u, b1, w2, b2, w3p, b3p)

    return out[:B, :1]


def init_params(key, state_dim, action_dim, h1=400, h2=300):
    """PyTorch nn.Linear default init: U(-1/sqrt(fan_in), 1/sqrt(fan_in))."""
    def linear(key, fan_in, fan_out):
        kw, kb = jax.random.split(key)
        bound = 1.0 / math.sqrt(fan_in)
        w = jax.random.uniform(kw, (fan_in, fan_out), jnp.float32,
                               minval=-bound, maxval=bound)
        b = jax.random.uniform(kb, (fan_out,), jnp.float32,
                               minval=-bound, maxval=bound)
        return w, b

    k1, k2, k3 = jax.random.split(key, 3)
    w1, b1 = linear(k1, state_dim + action_dim, h1)
    w2, b2 = linear(k2, h1, h2)
    w3, b3 = linear(k3, h2, 1)
    return {"w1": w1, "b1": b1, "w2": w2, "b2": b2, "w3": w3, "b3": b3}


def _reference_forward(x, u, params, use_bf16=True):
    mmd = jnp.bfloat16 if use_bf16 else jnp.float32
    xu = jnp.concatenate([x, u], axis=1)
    h = jnp.dot(xu.astype(mmd), params["w1"].astype(mmd),
                preferred_element_type=jnp.float32) + params["b1"]
    h = jnp.maximum(h, 0.0)
    h = jnp.dot(h.astype(mmd), params["w2"].astype(mmd),
                preferred_element_type=jnp.float32) + params["b2"]
    h = jnp.maximum(h, 0.0)
    q = jnp.dot(h.astype(mmd), params["w3"].astype(mmd),
                preferred_element_type=jnp.float32) + params["b3"]
    return q


if __name__ == "__main__":
    # Small shapes consistent with the module: hidden sizes fixed at 400/300,
    # batch / state / action chosen small and deliberately "ragged" to
    # exercise the padding path.
    B, STATE_DIM, ACTION_DIM = 10, 17, 6

    key = jax.random.PRNGKey(0)
    k_params, k_x, k_u = jax.random.split(key, 3)
    params = init_params(k_params, STATE_DIM, ACTION_DIM)
    x = jax.random.normal(k_x, (B, STATE_DIM), jnp.float32)
    u = jax.random.normal(k_u, (B, ACTION_DIM), jnp.float32)

    q = linear_critic_forward(x, u, params)
    q = jax.block_until_ready(q)
    assert q.shape == (B, 1)

    # tight check vs a reference using the same bf16-operand / f32-accum math
    ref_bf16 = _reference_forward(x, u, params, use_bf16=True)
    assert jnp.allclose(q, ref_bf16, atol=1e-3, rtol=1e-3), "mismatch vs bf16 reference"

    # loose check vs pure-f32 reference (bf16 operand rounding only)
    ref_f32 = _reference_forward(x, u, params, use_bf16=False)
    assert jnp.allclose(q, ref_f32, atol=5e-2, rtol=5e-2), "mismatch vs f32 reference"

    print("KERNEL_OK")
</pallas_src>

<mosaic_0001>
module attributes {stable_mosaic.version = 11 : i64} {
  func.func @_critic_kernel(%arg0: i32, %arg1: memref<16x17xbf16, #tpu.memory_space<vmem>>, %arg2: memref<16x6xbf16, #tpu.memory_space<vmem>>, %arg3: memref<17x400xbf16, #tpu.memory_space<vmem>>, %arg4: memref<6x400xbf16, #tpu.memory_space<vmem>>, %arg5: memref<1x400xf32, #tpu.memory_space<vmem>>, %arg6: memref<400x300xbf16, #tpu.memory_space<vmem>>, %arg7: memref<1x300xf32, #tpu.memory_space<vmem>>, %arg8: memref<300x128xbf16, #tpu.memory_space<vmem>>, %arg9: memref<1x128xf32, #tpu.memory_space<vmem>>, %arg10: memref<16x128xf32, #tpu.memory_space<vmem>>) attributes {dimension_semantics = [#tpu.dimension_semantics<parallel>], iteration_bounds = array<i64: 1>, scalar_prefetch = 0 : i64, scratch_operands = 0 : i64, tpu.core_type = #tpu.core_type<tc>, window_params = [{transform_indices = @transform_0, window_bounds = array<i64: 16, 17>}, {transform_indices = @transform_1, window_bounds = array<i64: 16, 6>}, {pipeline_mode = #tpu.pipeline_mode<synchronous>, transform_indices = @transform_2, window_bounds = array<i64: 17, 400>}, {pipeline_mode = #tpu.pipeline_mode<synchronous>, transform_indices = @transform_3, window_bounds = array<i64: 6, 400>}, {pipeline_mode = #tpu.pipeline_mode<synchronous>, transform_indices = @transform_4, window_bounds = array<i64: 1, 400>}, {pipeline_mode = #tpu.pipeline_mode<synchronous>, transform_indices = @transform_5, window_bounds = array<i64: 400, 300>}, {pipeline_mode = #tpu.pipeline_mode<synchronous>, transform_indices = @transform_6, window_bounds = array<i64: 1, 300>}, {pipeline_mode = #tpu.pipeline_mode<synchronous>, transform_indices = @transform_7, window_bounds = array<i64: 300, 128>}, {pipeline_mode = #tpu.pipeline_mode<synchronous>, transform_indices = @transform_8, window_bounds = array<i64: 1, 128>}, {transform_indices = @transform_9, window_bounds = array<i64: 16, 128>}]} {
    %c0 = arith.constant 0 : index
    %c0_0 = arith.constant 0 : index
    %0 = vector.load %arg1[%c0, %c0_0] : memref<16x17xbf16, #tpu.memory_space<vmem>>, vector<16x17xbf16>
    %c0_1 = arith.constant 0 : index
    %c0_2 = arith.constant 0 : index
    %1 = vector.load %arg3[%c0_1, %c0_2] : memref<17x400xbf16, #tpu.memory_space<vmem>>, vector<17x400xbf16>
    %cst = arith.constant dense<0.000000e+00> : vector<16x400xf32>
    %2 = tpu.matmul %0, %1, %cst {dimension_numbers = #tpu.dot_dimension_numbers<[1], [0], [0], [1], [0, 0, 1, 1], [], []>} : vector<16x17xbf16>, vector<17x400xbf16>, vector<16x400xf32> -> vector<16x400xf32>
    %c0_3 = arith.constant 0 : index
    %c0_4 = arith.constant 0 : index
    %3 = vector.load %arg2[%c0_3, %c0_4] : memref<16x6xbf16, #tpu.memory_space<vmem>>, vector<16x6xbf16>
    %c0_5 = arith.constant 0 : index
    %c0_6 = arith.constant 0 : index
    %4 = vector.load %arg4[%c0_5, %c0_6] : memref<6x400xbf16, #tpu.memory_space<vmem>>, vector<6x400xbf16>
    %cst_7 = arith.constant dense<0.000000e+00> : vector<16x400xf32>
    %5 = tpu.matmul %3, %4, %cst_7 {dimension_numbers = #tpu.dot_dimension_numbers<[1], [0], [0], [1], [0, 0, 1, 1], [], []>} : vector<16x6xbf16>, vector<6x400xbf16>, vector<16x400xf32> -> vector<16x400xf32>
    %6 = arith.addf %2, %5 : vector<16x400xf32>
    %c0_8 = arith.constant 0 : index
    %c0_9 = arith.constant 0 : index
    %7 = vector.load %arg5[%c0_8, %c0_9] : memref<1x400xf32, #tpu.memory_space<vmem>>, vector<1x400xf32>
    %8 = vector.broadcast %7 : vector<1x400xf32> to vector<16x400xf32>
    %9 = arith.addf %6, %8 : vector<16x400xf32>
    %cst_10 = arith.constant 0.000000e+00 : f32
    %10 = vector.broadcast %cst_10 : f32 to vector<16x400xf32>
    %11 = arith.maximumf %9, %10 : vector<16x400xf32>
    %12 = arith.truncf %11 : vector<16x400xf32> to vector<16x400xbf16>
    %c0_11 = arith.constant 0 : index
    %c0_12 = arith.constant 0 : index
    %13 = vector.load %arg6[%c0_11, %c0_12] : memref<400x300xbf16, #tpu.memory_space<vmem>>, vector<400x300xbf16>
    %cst_13 = arith.constant dense<0.000000e+00> : vector<16x300xf32>
    %14 = tpu.matmul %12, %13, %cst_13 {dimension_numbers = #tpu.dot_dimension_numbers<[1], [0], [0], [1], [0, 0, 1, 1], [], []>} : vector<16x400xbf16>, vector<400x300xbf16>, vector<16x300xf32> -> vector<16x300xf32>
    %c0_14 = arith.constant 0 : index
    %c0_15 = arith.constant 0 : index
    %15 = vector.load %arg7[%c0_14, %c0_15] : memref<1x300xf32, #tpu.memory_space<vmem>>, vector<1x300xf32>
    %16 = vector.broadcast %15 : vector<1x300xf32> to vector<16x300xf32>
    %17 = arith.addf %14, %16 : vector<16x300xf32>
    %cst_16 = arith.constant 0.000000e+00 : f32
    %18 = vector.broadcast %cst_16 : f32 to vector<16x300xf32>
    %19 = arith.maximumf %17, %18 : vector<16x300xf32>
    %20 = arith.truncf %19 : vector<16x300xf32> to vector<16x300xbf16>
    %c0_17 = arith.constant 0 : index
    %c0_18 = arith.constant 0 : index
    %21 = vector.load %arg8[%c0_17, %c0_18] : memref<300x128xbf16, #tpu.memory_space<vmem>>, vector<300x128xbf16>
    %cst_19 = arith.constant dense<0.000000e+00> : vector<16x128xf32>
    %22 = tpu.matmul %20, %21, %cst_19 {dimension_numbers = #tpu.dot_dimension_numbers<[1], [0], [0], [1], [0, 0, 1, 1], [], []>} : vector<16x300xbf16>, vector<300x128xbf16>, vector<16x128xf32> -> vector<16x128xf32>
    %c0_20 = arith.constant 0 : index
    %c0_21 = arith.constant 0 : index
    %23 = vector.load %arg9[%c0_20, %c0_21] : memref<1x128xf32, #tpu.memory_space<vmem>>, vector<1x128xf32>
    %24 = vector.broadcast %23 : vector<1x128xf32> to vector<16x128xf32>
    %25 = arith.addf %22, %24 : vector<16x128xf32>
    %c0_22 = arith.constant 0 : index
    %c0_23 = arith.constant 0 : index
    %26 = vector.load %arg10[%c0_22, %c0_23] : memref<16x128xf32, #tpu.memory_space<vmem>>, vector<16x128xf32>
    tpu.vector_store %arg10[%c0_22, %c0_23], %25 {strides = array<i32>} : memref<16x128xf32, #tpu.memory_space<vmem>>, vector<16x128xf32>,
    return
  }
  func.func @transform_0(%arg0: i32) -> (i32, i32) {
    %c0_i32 = arith.constant 0 : i32
    %c0_i32_0 = arith.constant 0 : i32
    return %arg0, %c0_i32 : i32, i32
  }
  func.func @transform_1(%arg0: i32) -> (i32, i32) {
    %c0_i32 = arith.constant 0 : i32
    %c0_i32_0 = arith.constant 0 : i32
    return %arg0, %c0_i32 : i32, i32
  }
  func.func @transform_2(%arg0: i32) -> (i32, i32) {
    %c0_i32 = arith.constant 0 : i32
    %c0_i32_0 = arith.constant 0 : i32
    %c0_i32_1 = arith.constant 0 : i32
    return %c0_i32, %c0_i32_0 : i32, i32
  }
  func.func @transform_3(%arg0: i32) -> (i32, i32) {
    %c0_i32 = arith.constant 0 : i32
    %c0_i32_0 = arith.constant 0 : i32
    %c0_i32_1 = arith.constant 0 : i32
    return %c0_i32, %c0_i32_0 : i32, i32
  }
  func.func @transform_4(%arg0: i32) -> (i32, i32) {
    %c0_i32 = arith.constant 0 : i32
    %c0_i32_0 = arith.constant 0 : i32
    %c0_i32_1 = arith.constant 0 : i32
    return %c0_i32, %c0_i32_0 : i32, i32
  }
  func.func @transform_5(%arg0: i32) -> (i32, i32) {
    %c0_i32 = arith.constant 0 : i32
    %c0_i32_0 = arith.constant 0 : i32
    %c0_i32_1 = arith.constant 0 : i32
    return %c0_i32, %c0_i32_0 : i32, i32
  }
  func.func @transform_6(%arg0: i32) -> (i32, i32) {
    %c0_i32 = arith.constant 0 : i32
    %c0_i32_0 = arith.constant 0 : i32
    %c0_i32_1 = arith.constant 0 : i32
    return %c0_i32, %c0_i32_0 : i32, i32
  }
  func.func @transform_7(%arg0: i32) -> (i32, i32) {
    %c0_i32 = arith.constant 0 : i32
    %c0_i32_0 = arith.constant 0 : i32
    %c0_i32_1 = arith.constant 0 : i32
    return %c0_i32, %c0_i32_0 : i32, i32
  }
  func.func @transform_8(%arg0: i32) -> (i32, i32) {
    %c0_i32 = arith.constant 0 : i32
    %c0_i32_0 = arith.constant 0 : i32
    %c0_i32_1 = arith.constant 0 : i32
    return %c0_i32, %c0_i32_0 : i32, i32
  }
  func.func @transform_9(%arg0: i32) -> (i32, i32) {
    %c0_i32 = arith.constant 0 : i32
    %c0_i32_0 = arith.constant 0 : i32
    return %arg0, %c0_i32 : i32, i32
  }
}

</mosaic_0001>

<bundles_post_ra>
// kernel: tpu_custom_call.1
= control target key start
LH: loop header
LB: loop body
LE: loop exit
PB: predicated region body
PF: predicated region fallthrough
CT: control target
= control target key end

     0   :  { %14 = vsyncpa [#allocation3], 0  ;;  %s2019_s0 = inlined_call_operand.hbm [shape: bf16[16,17], index: 0, kind: input, shape index: {}]   ;;  %s2020_s1 = inlined_call_operand.vmem [shape: bf16[16,6], index: 1, kind: input, shape index: {}]   ;;  %s2021_s2 = inlined_call_operand.hbm [shape: bf16[17,400], index: 2, kind: input, shape index: {}]   ;;  %s2022_s3 = inlined_call_operand.vmem [shape: bf16[6,400], index: 3, kind: input, shape index: {}]   ;;  %s2023_s4 = inlined_call_operand.vmem [shape: f32[1,400], index: 4, kind: input, shape index: {}]   ;;  %s2024_s5 = inlined_call_operand.hbm [shape: bf16[400,300], index: 5, kind: input, shape index: {}]   ;;  %s2025_s6 = inlined_call_operand.vmem [shape: f32[1,300], index: 6, kind: input, shape index: {}]   ;;  %s2026_s7 = inlined_call_operand.hbm [shape: bf16[300,128], index: 7, kind: input, shape index: {}]   ;;  %s2027_s8 = inlined_call_operand.vmem [shape: f32[1,128], index: 8, kind: input, shape index: {}]   ;;  %s2028_s9 = inlined_call_operand.hbm [shape: f32[16,128], index: 9, kind: output, shape index: {}]  }
   0x1   :  { %15 = vsyncpa [#allocation6], 0 }
   0x2   :  { %16 = vsyncpa [#allocation9], 0 }
   0x3   :  { %17 = vsyncpa [#allocation4], 0  ;;  %s1829_s30 = smov [#allocation5]   ;;  %s1711_s13 = scalar_lea.hbm %s2021_s2, 768 }
   0x4   :  { %s37_s10 = sshll.u32 %s1829_s30, 4  ;;  %p1712_p0 = scmp.ne.s32.totalorder %s2021_s2, %s1711_s13  ;;  %s38_s10 = int_to_ptr.vmem [resolvable:$true] %s37_s10 }
   0x5   :  { %p1715_p1 = scmp.lt.u32.totalorder %s1711_s13, %s2021_s2 }
   0x7   :  { %p1717_p2 = pnand %p1715_p1, %p1712_p0 }
   0x9   :  { %1720 = shalt.err (!%p1717_p2)
}
   0xa   :  { %s1721_s18 = scalar_lea.vmem %s38_s10, 768  ;;  %p1726_p4 = scmp.lt.s32.totalorder %s38_s10, %s38_s10 }
   0xb   :  { %p1722_p3 = scmp.ne.s32.totalorder %s38_s10, %s1721_s18  ;;  %p1727_p5 = scmp.lt.s32.totalorder %s1721_s18, %s1721_s18 }
   0xd   :  { %p1728_p6 = por %p1727_p5, %p1726_p4 }
   0xf   :  { %p1729_p7 = pnand %p1728_p6, %p1722_p3 }
  0x11   :  { %1732 = shalt.err (!%p1729_p7)
}
  0x12   :  { %s1830_s19 = smov 256   ;;  %s1831_s20 = smov 16  }
  0x13   :  { %43 = dma.hbm_to_vmem [thread:$0]  %s2021_s2, 768, %s38_s10, [#allocation6], %s1830_s19, %s1830_s19, %s1831_s20  }
  0x14   :  { %s1832_s23 = smov [#allocation2]   ;;  %s1733_s27 = scalar_lea.hbm %s2019_s0, 128 }
  0x15   :  { %s23_s24 = sshll.u32 %s1832_s23, 4  ;;  %p1734_p8 = scmp.ne.s32.totalorder %s2019_s0, %s1733_s27  ;;  %s24_s24 = int_to_ptr.vmem [resolvable:$true] %s23_s24 }
  0x16   :  { %p1737_p9 = scmp.lt.u32.totalorder %s1733_s27, %s2019_s0 }
  0x18   :  { %p1739_p10 = pnand %p1737_p9, %p1734_p8 }
  0x1a   :  { %1742 = shalt.err (!%p1739_p10)
}
  0x1b   :  { %s1743_s12 = scalar_lea.vmem %s24_s24, 128  ;;  %p1748_p12 = scmp.lt.s32.totalorder %s24_s24, %s24_s24 }
  0x1c   :  { %p1744_p11 = scmp.ne.s32.totalorder %s24_s24, %s1743_s12  ;;  %p1749_p13 = scmp.lt.s32.totalorder %s1743_s12, %s1743_s12 }
  0x1e   :  { %p1750_p0 = por %p1749_p13, %p1748_p12 }
  0x20   :  { %p1751_p1 = pnand %p1750_p0, %p1744_p11 }
  0x22   :  { %1754 = shalt.err (!%p1751_p1)
}
  0x23   :  { %s1833_s2 = smov 64   ;;  %s1834_s10 = smov 4  }
  0x24   :  { %29 = dma.hbm_to_vmem [thread:$0]  %s2019_s0, 128, %s24_s24, [#allocation3], %s1833_s2, %s1833_s2, %s1834_s10  }
  0x25   :  { %s1835_s15 = smov [#allocation7]   ;;  %s1755_s19 = scalar_lea.hbm %s2024_s5, 9600 }
  0x26   :  { %s53_s16 = sshll.u32 %s1835_s15, 4  ;;  %p1756_p2 = scmp.ne.s32.totalorder %s2024_s5, %s1755_s19  ;;  %s54_s16 = int_to_ptr.vmem [resolvable:$true] %s53_s16 }
  0x27   :  { %p1759_p3 = scmp.lt.u32.totalorder %s1755_s19, %s2024_s5 }
  0x29   :  { %p1761_p4 = pnand %p1759_p3, %p1756_p2 }
  0x2b   :  { %1764 = shalt.err (!%p1761_p4)
}
  0x2c   :  { %s1765_s25 = scalar_lea.vmem %s54_s16, 9600  ;;  %p1770_p6 = scmp.lt.s32.totalorder %s54_s16, %s54_s16 }
  0x2d   :  { %p1766_p5 = scmp.ne.s32.totalorder %s54_s16, %s1765_s25  ;;  %p1771_p7 = scmp.lt.s32.totalorder %s1765_s25, %s1765_s25 }
  0x2f   :  { %p1772_p8 = por %p1771_p7, %p1770_p6 }
  0x31   :  { %p1773_p9 = pnand %p1772_p8, %p1766_p5 }
  0x33   :  { %1776 = shalt.err (!%p1773_p9)
}
  0x34   :  { %s1836_s0 = smov 192   ;;  %s1837_s24 = smov 12  }
  0x35   :  { %59 = dma.hbm_to_vmem [thread:$0]  %s2024_s5, 9600, %s54_s16, [#allocation6], %s1836_s0, %s1836_s0, %s1837_s24  }
  0x36   :  { %s1838_s28 = smov [#allocation8]   ;;  %s1777_s12 = scalar_lea.hbm %s2026_s7, 2432 }
  0x37   :  { %s67_s29 = sshll.u32 %s1838_s28, 4  ;;  %p1778_p10 = scmp.ne.s32.totalorder %s2026_s7, %s1777_s12  ;;  %s68_s29 = int_to_ptr.vmem [resolvable:$true] %s67_s29 }
  0x38   :  { %p1781_p11 = scmp.lt.u32.totalorder %s1777_s12, %s2026_s7 }
  0x3a   :  { %p1783_p12 = pnand %p1781_p11, %p1778_p10 }
  0x3c   :  { %1786 = shalt.err (!%p1783_p12)
}
  0x3d   :  { %s1787_s18 = scalar_lea.vmem %s68_s29, 2432  ;;  %p1792_p0 = scmp.lt.s32.totalorder %s68_s29, %s68_s29 }
  0x3e   :  { %p1788_p13 = scmp.ne.s32.totalorder %s68_s29, %s1787_s18  ;;  %p1793_p1 = scmp.lt.s32.totalorder %s1787_s18, %s1787_s18 }
  0x40   :  { %p1794_p2 = por %p1793_p1, %p1792_p0 }
  0x42   :  { %p1795_p3 = pnand %p1794_p2, %p1788_p13 }
  0x44   :  { %1798 = shalt.err (!%p1795_p3)
}
  0x45   :  { %73 = dma.hbm_to_vmem [thread:$0]  %s2026_s7, 2432, %s68_s29, [#allocation9], %s1833_s2, %s1833_s2, %s1834_s10  }
  0x46   :  { %1821 = dma.done.wait [#allocation3], 128  }
  0x47   :  { %1822 = vsyncadd [#allocation3], 4294967168 }
  0x48   :  { %1823 = dma.done.wait [#allocation6], 10368  }
  0x49   :  { %1824 = vsyncadd [#allocation6], 4294956928 }
  0x4a   :  { %1825 = dma.done.wait [#allocation9], 2432  }
  0x4b   :  { %1826 = vsyncadd [#allocation9], 4294964864  ;;  %v1839_v0 = vmov 0   ;;  %vm258_vm0 = vcmask 1040384   ;;  %v1576_v1 = vld [vmem:[#allocation5 + $0x4] ss:$16 sps:$4 sm:$0xff]  }
  0x4c   :  { %165 = vmatprep.mubr.bf16.mxu1 %v1839_v0  ;;  %305 = vmatprep.mubr.bf16.mxu0 %v1839_v0  ;;  %vm120_vm1 = vcmask 1042432   ;;  %v260_v2 = vsel %vm258_vm0, 65535, %v1839_v0  ;;  %v99_v3 = vld [vmem:[%s2022_s3] sm:$0x77]  ;;  %v1579_v4 = vld [vmem:[#allocation5] ss:$16 sps:$4 sm:$0xff]  }
  0x4d   :  { %v95_v5 = vld [vmem:[#allocation5 + $0x20] sm:$0x11]  ;;  %273 = vmatprep.subr.bf16.mxu0 %v1576_v1  ;;  %v1370_v6 = vcombine.high %v99_v3, %v99_v3  ;;  %v1369_v7 = vcombine.low %v99_v3, %v99_v3  ;;  %v1582_v10 = vld [vmem:[%s2020_s1] sm:$0xff]   ;;  %vm116_vm2 = vcmask 48128   ;;  %v96_v19 = vld [vmem:[#allocation5 + $0x28] sm:$0x11] }
  0x4e   :  { %v1383_v8 = vcombine.high %v95_v5, %v95_v5  ;;  %v1382_v9 = vcombine.low %v95_v5, %v95_v5  ;;  %274 = vmatpush1.bf16.msra.mxu0 %v1579_v4  ;;  %v100_v14 = vld [vmem:[%s2022_s3 + $0x8] sm:$0x77]  ;;  %v1584_v15 = vld [vmem:[#allocation2] sm:$0xff]   ;;  %vm254_vm3 = vcmask 138240   ;;  %v1385_v24 = vcombine.high %v96_v19, %v96_v19  ;;  %v1595_v25 = vld [vmem:[#allocation7 + $0x18] ss:$12 sps:$4 sm:$0xff]  }
  0x4f   :  { %1373 = vmatprep.subr.msk.bf16.mxu1 %vm120_vm1, %v1370_v6  ;;  %v122_v11 = vsel %vm120_vm1, %v1369_v7, 0  ;;  %v1372_v16 = vcombine.high %v100_v14, %v100_v14  ;;  %v1371_v17 = vcombine.low %v100_v14, %v100_v14  ;;  %v1589_v18 = vld [vmem:[#allocation5 + $0xc] ss:$16 sps:$4 sm:$0xff]   ;;  %v1594_v21 = vld [vmem:[#allocation7 + $0x4] ss:$12 sps:$4 sm:$0xff]   ;;  %v1384_v27 = vcombine.low %v96_v19, %v96_v19  ;;  %s1842_s25 = smov [#allocation10]  }
  0x50   :  { %v265_v12 = vand.u32 %v1383_v8, %v260_v2  ;;  %v262_v13 = vand.u32 %v1382_v9, %v260_v2  ;;  %134 = vmatpush1.bf16.msra.mxu1 %v122_v11  ;;  %v1592_v22 = vld [vmem:[#allocation7] ss:$12 sps:$4 sm:$0xff]   ;;  %v1597_v23 = vld [vmem:[#allocation7 + $0x1c] ss:$12 sps:$4 sm:$0xff]   ;;  %v271_v28 = vand.u32 %v1385_v24, %v260_v2  ;;  %v1606_v35 = vld [vmem:[#allocation7 + $0x64] ss:$12 sps:$4 sm:$0xff]  }
  0x51   :  { %1375 = vmatprep.subr.msk.bf16.mxu1 %vm120_vm1, %v1372_v16  ;;  %v128_v20 = vsel %vm120_vm1, %v1371_v17, 0  ;;  %v1587_v26 = vld [vmem:[#allocation5 + $0x8] ss:$16 sps:$4 sm:$0xff]   ;;  %v1600_v29 = vld [vmem:[#allocation7 + $0x34] ss:$12 sps:$4 sm:$0xff]   ;;  %v268_v31 = vand.u32 %v1384_v27, %v260_v2  ;;  %vm918_vm4 = vcmask 130048  }
  0x52   :  { %275 = vmatprep.subr.bf16.mxu0 %v265_v12  ;;  %v1598_v30 = vld [vmem:[#allocation7 + $0x30] ss:$12 sps:$4 sm:$0xff]   ;;  %v1603_v32 = vld [vmem:[#allocation7 + $0x4c] ss:$12 sps:$4 sm:$0xff]   ;;  %v1619_v33 = vld [vmem:[#allocation7 + $0xc8] ss:$12 sps:$4 sm:$0xff]   ;;  %v361_v12 = vlaneseq }
  0x53   :  { %276 = vmatpush1.bf16.msra.mxu0 %v262_v13  ;;  %1374 = vmatmul.mubr.msk.bf16.vlgmr.msra.gmra.mrb[0].mxu1 %vm116_vm2, %v1582_v10  ;;  %v1601_v34 = vld [vmem:[#allocation7 + $0x48] ss:$12 sps:$4 sm:$0xff]   ;;  %v1604_v36 = vld [vmem:[#allocation7 + $0x60] ss:$12 sps:$4 sm:$0xff]   ;;  %v1607_v40 = vld [vmem:[#allocation7 + $0x78] ss:$12 sps:$4 sm:$0xff]  }
  0x54   :  { %177 = vmatpush1.bf16.msra.mxu1 %v128_v20  ;;  %208 = vmatprep.mubr.bf16.mxu1 %v1839_v0  ;;  %v1609_v37 = vld [vmem:[#allocation7 + $0x7c] ss:$12 sps:$4 sm:$0xff]   ;;  %v1624_v39 = vld [vmem:[#allocation7 + $0xe0] ss:$12 sps:$4 sm:$0xff]   ;;  %v1629_v44 = vld [vmem:[#allocation7 + $0xf8] ss:$12 sps:$4 sm:$0xff]  }
  0x55   :  { %316 = vmatprep.subr.bf16.mxu1 %v1589_v18  ;;  %922 = vmatprep.subr.bf16.mxu0 %v1594_v21  ;;  %v1620_v38 = vld [vmem:[#allocation7 + $0x8] ss:$12 sps:$4 sm:$0xff]   ;;  %v1625_v42 = vld [vmem:[#allocation7 + $0x20] ss:$12 sps:$4 sm:$0xff]   ;;  %v1610_v43 = vld [vmem:[#allocation7 + $0x90] ss:$12 sps:$4 sm:$0xff]  }
  0x56   :  { %1386 = vmatmul.mubr.msk.bf16.vlgmr.msra.gmra.mrb[0].mxu0 %vm254_vm3, %v1584_v15  ;;  %v1612_v41 = vld [vmem:[#allocation7 + $0x94] ss:$12 sps:$4 sm:$0xff]   ;;  %v1615_v45 = vld [vmem:[#allocation7 + $0xac] ss:$12 sps:$4 sm:$0xff]   ;;  %v1634_v47 = vld [vmem:[#allocation7 + $0x110] ss:$12 sps:$4 sm:$0xff]  }
  0x57   :  { %923 = vmatpush1.bf16.msra.mxu0 %v1592_v22  ;;  %v1630_v46 = vld [vmem:[#allocation7 + $0x38] ss:$12 sps:$4 sm:$0xff]   ;;  %v1613_v48 = vld [vmem:[#allocation7 + $0xa8] ss:$12 sps:$4 sm:$0xff]   ;;  %v1635_v50 = vld [vmem:[#allocation7 + $0x50] ss:$12 sps:$4 sm:$0xff]  }
  0x58   :  { %924 = vmatprep.subr.bf16.mxu0 %v1597_v23  ;;  %v1618_v49 = vld [vmem:[#allocation7 + $0xc4] ss:$12 sps:$4 sm:$0xff]   ;;  %v1639_v51 = vld [vmem:[#allocation7 + $0x128] ss:$12 sps:$4 sm:$0xff]   ;;  %v1616_v52 = vld [vmem:[#allocation7 + $0xc0] ss:$12 sps:$4 sm:$0xff]  }
  0x59   :  { %v1623_v53 = vld [vmem:[#allocation7 + $0xdc] ss:$12 sps:$4 sm:$0xff]   ;;  %v1621_v54 = vld [vmem:[#allocation7 + $0xd8] ss:$12 sps:$4 sm:$0xff]   ;;  %v1628_v55 = vld [vmem:[#allocation7 + $0xf4] ss:$12 sps:$4 sm:$0xff]  }
  0x5a   :  { %v1626_v56 = vld [vmem:[#allocation7 + $0xf0] ss:$12 sps:$4 sm:$0xff]   ;;  %v1633_v57 = vld [vmem:[#allocation7 + $0x10c] ss:$12 sps:$4 sm:$0xff]   ;;  %v1631_v58 = vld [vmem:[#allocation7 + $0x108] ss:$12 sps:$4 sm:$0xff]  }
  0x5b   :  { %1376 = vmatmul.mubr.msk.bf16.vlgmr.msra.gmra.mrb[4].mxu1 %vm116_vm2, %v1582_v10  ;;  %925 = vmatpush1.bf16.msra.mxu0 %v1595_v25  ;;  %v1638_v59 = vld [vmem:[#allocation7 + $0x124] ss:$12 sps:$4 sm:$0xff]   ;;  %v1636_v60 = vld [vmem:[#allocation7 + $0x120] ss:$12 sps:$4 sm:$0xff]   ;;  %v1640_v61 = vld [vmem:[#allocation7 + $0x68] ss:$12 sps:$4 sm:$0xff]  }
  0x5c   :  { %317 = vmatpush1.bf16.msra.mxu1 %v1587_v26  ;;  %348 = vmatprep.mubr.bf16.mxu1 %v1839_v0  ;;  %v1643_v62 = vld [vmem:[#allocation7 + $0x13c] ss:$12 sps:$4 sm:$0xff]   ;;  %v1644_v63 = vld [vmem:[#allocation7 + $0x140] ss:$12 sps:$4 sm:$0xff]   ;;  %v1641_v1 = vld [vmem:[#allocation7 + $0x138] ss:$12 sps:$4 sm:$0xff]  }
  0x5d   :  { %318 = vmatprep.subr.bf16.mxu1 %v271_v28  ;;  %926 = vmatprep.subr.bf16.mxu0 %v1600_v29  ;;  %v1645_v2 = vld [vmem:[#allocation7 + $0x80] ss:$12 sps:$4 sm:$0xff]   ;;  %v1649_v4 = vld [vmem:[#allocation7 + $0x158] ss:$12 sps:$4 sm:$0xff]   ;;  %v1646_v5 = vld [vmem:[#allocation7 + $0x150] ss:$12 sps:$4 sm:$0xff]  }
  0x5e   :  { %v1648_v3 = vld [vmem:[#allocation7 + $0x154] ss:$12 sps:$4 sm:$0xff]   ;;  %v1650_v6 = vld [vmem:[#allocation7 + $0x98] ss:$12 sps:$4 sm:$0xff]   ;;  %v1654_v8 = vld [vmem:[#allocation7 + $0x170] ss:$12 sps:$4 sm:$0xff]  }
  0x5f   :  { %927 = vmatpush1.bf16.msra.mxu0 %v1598_v30  ;;  %v1653_v7 = vld [vmem:[#allocation7 + $0x16c] ss:$12 sps:$4 sm:$0xff]   ;;  %v1651_v9 = vld [vmem:[#allocation7 + $0x168] ss:$12 sps:$4 sm:$0xff]   ;;  %v1655_v10 = vld [vmem:[#allocation7 + $0xb0] ss:$12 sps:$4 sm:$0xff]  }
  0x60   :  { %319 = vmatpush1.bf16.msra.mxu1 %v268_v31  ;;  %928 = vmatprep.subr.bf16.mxu0 %v1603_v32  ;;  %v1658_v11 = vld [vmem:[#allocation7 + $0x184] ss:$12 sps:$4 sm:$0xff]   ;;  %v1972_v13 = vshrl.u32 %v361_v12, 7  ;;  %v1679_v12 = vld [vmem:[#allocation7 + $0x200] ss:$12 sps:$4 sm:$0xff]   ;;  %vm1261_vm5 = vcmask 1045504  }
  0x61   :  { %1486 = vmatprep.subr.bf16.mxu1 %v1619_v33  ;;  %vm1841_vm6 = vmmov 0   ;;  %vm1257_vm7 = vcmask 359424   ;;  %s1354_s0 = sshll.u32 %s1842_s25, 4  ;;  %s1355_s0 = int_to_ptr.vmem [resolvable:$true] %s1354_s0 }
  0x62   :  { %v363_v14 = vsub.s32 0, %v1972_v13  ;;  %v367_v16 = vsub.s32 1, %v1972_v13  ;;  %s1799_s24 = scalar_lea.vmem %s1355_s0, 256  ;;  %p1804_p5 = scmp.lt.s32.totalorder %s1355_s0, %s1355_s0 }
  0x63   :  { %929 = vmatpush1.bf16.msra.mxu0 %v1601_v34  ;;  %p1800_p4 = scmp.ne.s32.totalorder %s1355_s0, %s1799_s24  ;;  %p1805_p6 = scmp.lt.s32.totalorder %s1799_s24, %s1799_s24 }
  0x64   :  { %930 = vmatprep.subr.bf16.mxu0 %v1606_v35 }
  0x65   :  { %p1806_p7 = por %p1805_p6, %p1804_p5 }
  0x67   :  { %1387 = vmatmul.mubr.msk.bf16.vlgmr.msra.gmra.mrb[4].mxu1 %vm254_vm3, %v1584_v15  ;;  %931 = vmatpush1.bf16.msra.mxu0 %v1604_v36  ;;  %v359_v15 = vld [vmem:[%s2023_s4] sm:$0xf]  ;;  %p1807_p8 = pnand %p1806_p7, %p1800_p4 }
  0x68   :  { %932 = vmatprep.subr.bf16.mxu0 %v1609_v37  ;;  %1487 = vmatpush3.bf16.msra.mxu1 %v1620_v38  ;;  %v364_v19 = vrot.slane %v359_v15, %v363_v14  ;;  %v368_v22 = vrot.slane %v359_v15, %v367_v16 }
  0x69   :  { %1488 = vmatprep.subr.bf16.mxu1 %v1624_v39 }
  0x6b   :  { %933 = vmatpush1.bf16.msra.mxu0 %v1607_v40 }
  0x6c   :  { %934 = vmatprep.subr.bf16.mxu0 %v1612_v41  ;;  %1489 = vmatpush3.bf16.msra.mxu1 %v1625_v42  ;;  %v1656_v41 = vld [vmem:[#allocation7 + $0x180] ss:$12 sps:$4 sm:$0xff]   ;;  %v1659_v42 = vld [vmem:[#allocation7 + $0x188] ss:$12 sps:$4 sm:$0xff]  }
  0x6d   :  { %1490 = vmatprep.subr.bf16.mxu1 %v1629_v44  ;;  %v371_v44 = vsub.s32 2, %v1972_v13 }
  0x6f   :  { %935 = vmatpush1.bf16.msra.mxu0 %v1610_v43  ;;  %v1662_v43 = vld [vmem:[#allocation7 + $0x19c] ss:$12 sps:$4 sm:$0xff]  }
  0x70   :  { %936 = vmatprep.subr.bf16.mxu0 %v1615_v45  ;;  %1491 = vmatpush3.bf16.msra.mxu1 %v1630_v46  ;;  %v375_v45 = vsub.s32 3, %v1972_v13  ;;  %v1660_v46 = vld [vmem:[#allocation7 + $0x198] ss:$12 sps:$4 sm:$0xff]  }
  0x71   :  { %1492 = vmatprep.subr.bf16.mxu1 %v1634_v47  ;;  %v1663_v47 = vld [vmem:[#allocation7 + $0x1a0] ss:$12 sps:$4 sm:$0xff]  }
  0x73   :  { %937 = vmatpush1.bf16.msra.mxu0 %v1613_v48  ;;  %v1666_v48 = vld [vmem:[#allocation7 + $0x1b4] ss:$12 sps:$4 sm:$0xff]  }
  0x74   :  { %938 = vmatprep.subr.bf16.mxu0 %v1618_v49  ;;  %1493 = vmatpush3.bf16.msra.mxu1 %v1635_v50  ;;  %v372_v49 = vrot.slane %v359_v15, %v371_v44  ;;  %v376_v50 = vrot.slane %v359_v15, %v375_v45  ;;  %v1682_v15 = vld [vmem:[#allocation7 + $0x214] ss:$12 sps:$4 sm:$0xff]  }
  0x75   :  { %1494 = vmatprep.subr.bf16.mxu1 %v1639_v51  ;;  %v1664_v51 = vld [vmem:[#allocation7 + $0x1b0] ss:$12 sps:$4 sm:$0xff]  }
  0x76   :  { %v1710_v45 = vld [vmem:[#allocation8 + $0x38] sm:$0xff]  }
  0x77   :  { %939 = vmatpush1.bf16.msra.mxu0 %v1616_v52  ;;  %v1667_v52 = vld [vmem:[#allocation7 + $0x1b8] ss:$12 sps:$4 sm:$0xff]  }
  0x78   :  { %940 = vmatprep.subr.bf16.mxu0 %v1623_v53  ;;  %1495 = vmatpush3.bf16.msra.mxu1 %v1640_v61 }
  0x79   :  { %1496 = vmatprep.subr.bf16.mxu1 %v1644_v63  ;;  %v1668_v63 = vld [vmem:[#allocation7 + $0x1c8] ss:$12 sps:$4 sm:$0xff]  }
  0x7b   :  { %941 = vmatpush1.bf16.msra.mxu0 %v1621_v54 }
  0x7c   :  { %942 = vmatprep.subr.bf16.mxu0 %v1628_v55  ;;  %1497 = vmatpush3.bf16.msra.mxu1 %v1645_v2  ;;  %v1671_v2 = vld [vmem:[#allocation7 + $0x1d0] ss:$12 sps:$4 sm:$0xff]  }
  0x7d   :  { %1498 = vmatprep.subr.bf16.mxu1 %v1649_v4  ;;  %v1674_v4 = vld [vmem:[#allocation7 + $0x1e4] ss:$12 sps:$4 sm:$0xff]  }
  0x7f   :  { %943 = vmatpush1.bf16.msra.mxu0 %v1626_v56  ;;  %v1670_v56 = vld [vmem:[#allocation7 + $0x1cc] ss:$12 sps:$4 sm:$0xff]  }
  0x80   :  { %944 = vmatprep.subr.bf16.mxu0 %v1633_v57  ;;  %1499 = vmatpush3.bf16.msra.mxu1 %v1650_v6 }
  0x81   :  { %1500 = vmatprep.subr.bf16.mxu1 %v1654_v8  ;;  %v1672_v8 = vld [vmem:[#allocation7 + $0x1e0] ss:$12 sps:$4 sm:$0xff]  }
  0x83   :  { %945 = vmatpush1.bf16.msra.mxu0 %v1631_v58 }
  0x84   :  { %946 = vmatprep.subr.bf16.mxu0 %v1638_v59  ;;  %1501 = vmatpush3.bf16.msra.mxu1 %v1655_v10  ;;  %v1678_v10 = vld [vmem:[#allocation7 + $0x1fc] ss:$12 sps:$4 sm:$0xff]  }
  0x85   :  { %1049 = vmatprep.subr.bf16.mxu1 %v1839_v0 }
  0x87   :  { %947 = vmatpush1.bf16.msra.mxu0 %v1636_v60 }
  0x88   :  { %948 = vmatprep.subr.bf16.mxu0 %v1643_v62 }
  0x8b   :  { %949 = vmatpush1.bf16.msra.mxu0 %v1641_v1 }
  0x8c   :  { %950 = vmatprep.subr.bf16.mxu0 %v1648_v3 }
  0x8f   :  { %951 = vmatpush1.bf16.msra.mxu0 %v1646_v5 }
  0x90   :  { %952 = vmatprep.subr.bf16.mxu0 %v1653_v7 }
  0x93   :  { %953 = vmatpush1.bf16.msra.mxu0 %v1651_v9  ;;  %v1675_v9 = vld [vmem:[#allocation7 + $0x1e8] ss:$12 sps:$4 sm:$0xff]  }
  0x94   :  { %965 = vmatprep.subr.bf16.mxu0 %v1658_v11  ;;  %v1676_v11 = vld [vmem:[#allocation7 + $0x1f8] ss:$12 sps:$4 sm:$0xff]  }
 0x126   :  { %v167_v17 = vpop.f32.mrb[0].mxu1 }
 0x127   :  { %v169_v18 = vpop.f32.mrb[1].mxu1 }
 0x128   :  { %v171_v20 = vpop.f32.mrb[2].mxu1 }
 0x129   :  { %v307_v21 = vpop.f32.mrb[0].mxu0  ;;  %v173_v23 = vpop.f32.mrb[3].mxu1 }
 0x12a   :  { %v308_v24 = vadd.f32 %v307_v21, %v167_v17  ;;  %v309_v25 = vpop.f32.mrb[1].mxu0  ;;  %v1680_v17 = vld [vmem:[#allocation7 + $0x210] ss:$12 sps:$4 sm:$0xff]  }
 0x12b   :  { %v310_v26 = vadd.f32 %v309_v25, %v169_v18  ;;  %v311_v27 = vpop.f32.mrb[2].mxu0  ;;  %v1683_v18 = vld [vmem:[#allocation7 + $0x218] ss:$12 sps:$4 sm:$0xff]   ;;  %v1687_v21 = vld [vmem:[#allocation7 + $0x230] ss:$12 sps:$4 sm:$0xff]  }
 0x12c   :  { %v381_v28 = vadd.f32 %v364_v19, %v308_v24  ;;  %v312_v29 = vadd.f32 %v311_v27, %v171_v20  ;;  %v313_v30 = vpop.f32.mrb[3].mxu0  ;;  %v1684_v20 = vld [vmem:[#allocation7 + $0x228] ss:$12 sps:$4 sm:$0xff]   ;;  %v1692_v25 = vld [vmem:[#allocation8 + $0x40] sm:$0xff]   ;;  %v1694_v27 = vld [vmem:[#allocation8 + $0x48] sm:$0xff]  }
 0x12d   :  { %v382_v31 = vadd.f32 %v368_v22, %v310_v26  ;;  %v314_v32 = vadd.f32 %v313_v30, %v173_v23  ;;  %v1688_v23 = vld [vmem:[#allocation7 + $0x240] ss:$12 sps:$4 sm:$0xff]   ;;  %v1691_v24 = vld [vmem:[#allocation7 + $0x248] ss:$12 sps:$4 sm:$0xff]   ;;  %v1693_v26 = vld [vmem:[#allocation8] sm:$0xff]  }
 0x12e   :  { %v385_v33 = vadd.f32 %v364_v19, %v312_v29  ;;  %v389_v35 = vmax.f32 %v381_v28, 0.0  ;;  %v1686_v19 = vld [vmem:[#allocation7 + $0x22c] ss:$12 sps:$4 sm:$0xff]   ;;  %v1840_v28 = vmov 0.0   ;;  %v1695_v29 = vld [vmem:[#allocation8 + $0x8] sm:$0xff]  }
 0x12f   :  { %v386_v34 = vadd.f32 %v368_v22, %v314_v32  ;;  %v390_v37 = vmax.f32 %v382_v31, 0.0  ;;  %v1690_v22 = vld [vmem:[#allocation7 + $0x244] ss:$12 sps:$4 sm:$0xff]   ;;  %v1702_v30 = vld [vmem:[#allocation8 + $0x80] sm:$0xff]   ;;  %v1696_v31 = vld [vmem:[#allocation8 + $0x50] sm:$0xff]  }
 0x130   :  { %v393_v36 = vmax.f32 %v385_v33, 0.0  ;;  %v1697_v32 = vld [vmem:[#allocation8 + $0x10] sm:$0xff]   ;;  %v1699_v33 = vld [vmem:[#allocation8 + $0x18] sm:$0xff]  }
 0x131   :  { %v394_v38 = vmax.f32 %v386_v34, 0.0  ;;  %v1700_v34 = vld [vmem:[#allocation8 + $0x60] sm:$0xff]  }
 0x132   :  { %v397_v39 = vpack.c.bf16 %v393_v36, %v389_v35  ;;  %v1701_v35 = vld [vmem:[#allocation8 + $0x20] sm:$0xff]   ;;  %v1703_v36 = vld [vmem:[#allocation8 + $0x68] sm:$0xff]  }
 0x133   :  { %v398_v40 = vpack.c.bf16 %v394_v38, %v390_v37  ;;  %v1704_v37 = vld [vmem:[#allocation8 + $0x28] sm:$0xff]  }
 0x134   :  { %v1705_v38 = vld [vmem:[#allocation8 + $0x88] sm:$0xff]  }
 0x135   :  { %954 = vmatprep.mubr.bf16.mxu0 %v398_v40  ;;  %1040 = vmatprep.mubr.bf16.mxu1 %v398_v40  ;;  %v1707_v40 = vld [vmem:[#allocation8 + $0x30] sm:$0xff]  }
 0x136   :  { %955 = vmatmul.mubr.bf16.vlgmr.msra.gmra.mrb[4].mxu0 %v397_v39  ;;  %1041 = vmatmul.mubr.bf16.vlgmr.msra.gmra.mrb[8].mxu1 %v397_v39  ;;  %v1706_v39 = vld [vmem:[#allocation8 + $0x70] sm:$0xff]  }
 0x137   :  { %966 = vmatpush1.bf16.msra.mxu0 %v1656_v41  ;;  %1050 = vmatpush1.bf16.msra.mxu1 %v1659_v42  ;;  %v1708_v41 = vld [vmem:[#allocation8 + $0x90] sm:$0x3f]  }
 0x138   :  { %967 = vmatprep.subr.bf16.mxu0 %v1662_v43  ;;  %1051 = vmatprep.subr.bf16.mxu1 %v1839_v0  ;;  %v1263_v42 = vsel %vm1261_vm5, %v1708_v41, 0  ;;  %v1709_v43 = vld [vmem:[#allocation8 + $0x78] sm:$0xff]  }
 0x13a   :  { %v350_v53 = vpop.f32.mrb[4].mxu1 }
 0x13b   :  { %968 = vmatpush1.bf16.msra.mxu0 %v1660_v46  ;;  %1052 = vmatpush1.bf16.msra.mxu1 %v1663_v47  ;;  %v383_v54 = vadd.f32 %v372_v49, %v350_v53  ;;  %v352_v55 = vpop.f32.mrb[5].mxu1 }
 0x13c   :  { %969 = vmatprep.subr.bf16.mxu0 %v1666_v48  ;;  %1053 = vmatprep.subr.bf16.mxu1 %v1839_v0  ;;  %v384_v57 = vadd.f32 %v376_v50, %v352_v55  ;;  %v354_v58 = vpop.f32.mrb[6].mxu1 }
 0x13d   :  { %v391_v59 = vmax.f32 %v383_v54, 0.0  ;;  %v387_v60 = vadd.f32 %v372_v49, %v354_v58  ;;  %v356_v61 = vpop.f32.mrb[7].mxu1 }
 0x13e   :  { %v392_v62 = vmax.f32 %v384_v57, 0.0  ;;  %v388_v1 = vadd.f32 %v376_v50, %v356_v61 }
 0x13f   :  { %970 = vmatpush1.bf16.msra.mxu0 %v1664_v51  ;;  %1054 = vmatpush1.bf16.msra.mxu1 %v1667_v52  ;;  %v395_v3 = vmax.f32 %v387_v60, 0.0  ;;  %v501_v52 = vld [vmem:[%s2025_s6] sm:$0x7] }
 0x140   :  { %971 = vmatprep.subr.bf16.mxu0 %v1670_v56  ;;  %1055 = vmatprep.subr.bf16.mxu1 %v1839_v0  ;;  %v396_v5 = vmax.f32 %v388_v1, 0.0  ;;  %v514_v53 = vrot.slane %v501_v52, %v371_v44  ;;  %v506_v54 = vrot.slane %v501_v52, %v363_v14  ;;  %v510_v55 = vrot.slane %v501_v52, %v367_v16 }
 0x141   :  { %v399_v6 = vpack.c.bf16 %v395_v3, %v391_v59 }
 0x142   :  { %v400_v7 = vpack.c.bf16 %v396_v5, %v392_v62 }
 0x143   :  { %972 = vmatpush1.bf16.msra.mxu0 %v1668_v63  ;;  %1056 = vmatpush1.bf16.msra.mxu1 %v1671_v2 }
 0x144   :  { %973 = vmatprep.subr.bf16.mxu0 %v1674_v4  ;;  %1057 = vmatprep.subr.bf16.mxu1 %v1839_v0 }
 0x145   :  { %1463 = vmatprep.mubr.msk.bf16.mxu0 %vm918_vm4, %v400_v7  ;;  %1464 = vmatprep.mubr.msk.bf16.mxu1 %vm918_vm4, %v400_v7 }
 0x147   :  { %974 = vmatpush1.bf16.msra.mxu0 %v1672_v8  ;;  %1058 = vmatpush1.bf16.msra.mxu1 %v1675_v9 }
 0x148   :  { %975 = vmatprep.subr.bf16.mxu0 %v1678_v10  ;;  %1059 = vmatprep.subr.bf16.mxu1 %v1839_v0 }
 0x14b   :  { %976 = vmatpush1.bf16.msra.mxu0 %v1676_v11  ;;  %1060 = vmatpush1.bf16.msra.mxu1 %v1679_v12 }
 0x14c   :  { %977 = vmatprep.subr.bf16.mxu0 %v1682_v15  ;;  %1061 = vmatprep.subr.bf16.mxu1 %v1839_v0 }
 0x14f   :  { %978 = vmatpush1.bf16.msra.mxu0 %v1680_v17  ;;  %1062 = vmatpush1.bf16.msra.mxu1 %v1683_v18 }
 0x150   :  { %979 = vmatprep.subr.bf16.mxu0 %v1686_v19  ;;  %1063 = vmatprep.subr.bf16.mxu1 %v1839_v0 }
 0x153   :  { %980 = vmatpush1.bf16.msra.mxu0 %v1684_v20  ;;  %1064 = vmatpush1.bf16.msra.mxu1 %v1687_v21  ;;  %v1465_v21 = vld [vmem:[%s2027_s8] ss:$0 sm:$0xff] }
 0x154   :  { %981 = vmatprep.subr.bf16.mxu0 %v1690_v22  ;;  %1065 = vmatprep.subr.bf16.mxu1 %v1839_v0  ;;  %v1698_v0 = vld [vmem:[#allocation8 + $0x58] sm:$0xff]  }
 0x157   :  { %982 = vmatpush1.bf16.msra.mxu0 %v1688_v23  ;;  %1066 = vmatpush1.bf16.msra.mxu1 %v1691_v24 }
 0x158   :  { %1534 = vmatprep.subr.bf16.mxu0 %v1840_v28  ;;  %1508 = vmatprep.subr.bf16.mxu1 %v1692_v25 }
 0x15a   :  { %998 = vmatmul.mubr.bf16.vlgmr.msra.gmra.mrb[4].mxu0 %v399_v6  ;;  %1082 = vmatmul.mubr.bf16.vlgmr.msra.gmra.mrb[12].mxu1 %v399_v6 }
 0x15b   :  { %1509 = vmatpush3.bf16.msra.mxu1 %v1693_v26  ;;  %1535 = vmatpush3.bf16.msra.mxu0 %v1702_v30 }
 0x15c   :  { %1510 = vmatprep.subr.bf16.mxu1 %v1694_v27  ;;  %1536 = vmatprep.subr.bf16.mxu0 %v1840_v28 }
 0x15d   :  { %1540 = vmatprep.mubr.msk.bf16.mxu0 %vm1841_vm6, %v1840_v28 }
 0x15f   :  { %1511 = vmatpush3.bf16.msra.mxu1 %v1695_v29  ;;  %1537 = vmatpush3.bf16.msra.mxu0 %v1705_v38 }
 0x160   :  { %1512 = vmatprep.subr.bf16.mxu1 %v1696_v31  ;;  %1538 = vmatprep.subr.bf16.mxu0 %v1840_v28 }
 0x163   :  { %1513 = vmatpush3.bf16.msra.mxu1 %v1697_v32  ;;  %1539 = vmatpush3.bf16.msra.mxu0 %v1263_v42 }
 0x164   :  { %1514 = vmatprep.subr.bf16.mxu1 %v1698_v0 }
 0x167   :  { %1515 = vmatpush3.bf16.msra.mxu1 %v1699_v33 }
 0x168   :  { %1516 = vmatprep.subr.bf16.mxu1 %v1700_v34 }
 0x16b   :  { %1517 = vmatpush3.bf16.msra.mxu1 %v1701_v35 }
 0x16c   :  { %1518 = vmatprep.subr.bf16.mxu1 %v1703_v36 }
 0x16f   :  { %1519 = vmatpush3.bf16.msra.mxu1 %v1704_v37 }
 0x170   :  { %1520 = vmatprep.subr.bf16.mxu1 %v1706_v39 }
 0x173   :  { %1521 = vmatpush3.bf16.msra.mxu1 %v1707_v40 }
 0x174   :  { %1522 = vmatprep.subr.bf16.mxu1 %v1709_v43 }
 0x177   :  { %1523 = vmatpush3.bf16.msra.mxu1 %v1710_v45 }
 0x209   :  { %v1502_v46 = vpop.f32.mrb[8].mxu1 }
 0x20a   :  { %v1503_v47 = vpop.f32.mrb[9].mxu1 }
 0x20b   :  { %v1504_v48 = vadd.f32 %v1503_v47, %v1502_v46  ;;  %v1505_v49 = vpop.f32.mrb[10].mxu1 }
 0x20c   :  { %v1506_v50 = vpop.f32.mrb[11].mxu1 }
 0x20d   :  { %v1507_v51 = vadd.f32 %v1506_v50, %v1505_v49  ;;  %v1043_v56 = vadd.f32 %v1504_v48, %v514_v53 }
 0x20f   :  { %v1046_v63 = vadd.f32 %v1507_v51, %v514_v53 }
 0x22d   :  { %v999_v57 = vpop.f32.mrb[4].mxu0  ;;  %v1083_v58 = vpop.f32.mrb[12].mxu1 }
 0x22e   :  { %v1548_v59 = vadd.f32 %v999_v57, %v506_v54  ;;  %v1084_v60 = vadd.f32 %v1083_v58, %v1043_v56  ;;  %v1001_v61 = vpop.f32.mrb[5].mxu0  ;;  %v1085_v62 = vpop.f32.mrb[13].mxu1 }
 0x22f   :  { %v1549_v1 = vadd.f32 %v1001_v61, %v510_v55  ;;  %v1003_v2 = vpop.f32.mrb[6].mxu0  ;;  %v1086_v3 = vpop.f32.mrb[14].mxu1 }
 0x230   :  { %v1550_v4 = vadd.f32 %v1003_v2, %v506_v54  ;;  %v1087_v5 = vadd.f32 %v1086_v3, %v1046_v63  ;;  %v1005_v44 = vpop.f32.mrb[7].mxu0  ;;  %v1088_v6 = vpop.f32.mrb[15].mxu1  ;;  %v1090_v14 = vmax.f32 %v1548_v59, 0.0  ;;  %v1092_v8 = vmax.f32 %v1084_v60, 0.0 }
 0x231   :  { %v1551_v7 = vadd.f32 %v1005_v44, %v510_v55  ;;  %v1091_v9 = vmax.f32 %v1549_v1, 0.0 }
 0x232   :  { %v1093_v13 = vmax.f32 %v1550_v4, 0.0  ;;  %v1095_v16 = vmax.f32 %v1087_v5, 0.0 }
 0x233   :  { %v1094_v10 = vmax.f32 %v1551_v7, 0.0 }
 0x234   :  { %v1096_v11 = vpack.c.bf16 %v1093_v13, %v1090_v14  ;;  %v1098_v12 = vpack.c.bf16 %v1095_v16, %v1092_v8 }
 0x235   :  { %v1097_v15 = vpack.c.bf16 %v1094_v10, %v1091_v9 }
 0x236   :  { %1541 = vmatmul.mubr.msk.bf16.vlgmr.msra.gmra.mrb[8].mxu0 %vm1257_vm7, %v1098_v12 }
 0x237   :  { %1297 = vmatprep.mubr.bf16.mxu1 %v1097_v15 }
 0x238   :  { %1298 = vmatmul.mubr.bf16.vlgmr.msra.gmra.mrb[16].mxu1 %v1096_v11 }
 0x309   :  { %v1340_v17 = vpop.f32.mrb[8].mxu0 }
 0x30a   :  { %v1542_v18 = vpop.f32.mrb[9].mxu0 }
 0x30b   :  { %v1524_v19 = vpop.f32.mrb[16].mxu1  ;;  %v1343_v20 = vpop.f32.mrb[10].mxu0 }
 0x30c   :  { %v1525_v22 = vpop.f32.mrb[17].mxu1  ;;  %v1543_v23 = vpop.f32.mrb[11].mxu0 }
 0x30d   :  { %v1526_v24 = vadd.f32 %v1525_v22, %v1524_v19  ;;  %v1527_v25 = vpop.f32.mrb[18].mxu1 }
 0x30e   :  { %v1528_v26 = vpop.f32.mrb[19].mxu1 }
 0x30f   :  { %v1300_v27 = vadd.f32 %v1526_v24, %v1465_v21  ;;  %v1529_v28 = vadd.f32 %v1528_v26, %v1527_v25 }
 0x311   :  { %v1341_v29 = vadd.f32 %v1340_v17, %v1300_v27  ;;  %v1303_v30 = vadd.f32 %v1529_v28, %v1465_v21 }
 0x313   :  { %1347 = vst [vmem:[#allocation10] sm:$0xff] %v1341_v29  ;;  %v1344_v31 = vadd.f32 %v1343_v20, %v1303_v30 }
 0x315   :  { %1348 = vst [vmem:[#allocation10 + $0x8] sm:$0xff] %v1344_v31 }
 0x316   :  { %1810 = shalt.err (!%p1807_p8)
}
 0x317   :  { %s1811_s27 = scalar_lea.hbm %s2028_s9, 256 }
 0x318   :  { %p1812_p9 = scmp.ne.s32.totalorder %s2028_s9, %s1811_s27  ;;  %p1815_p10 = scmp.lt.u32.totalorder %s1811_s27, %s2028_s9 }
 0x31a   :  { %p1817_p11 = pnand %p1815_p10, %p1812_p9 }
 0x31c   :  { %1820 = shalt.err (!%p1817_p11)
}
 0x31d   :  { %s1843_s12 = smov 128   ;;  %s1844_s13 = smov 8  }
 0x31e   :  { %1360 = dma.vmem_to_hbm [thread:$0]  %s1355_s0, 256, %s2028_s9, [#allocation4], %s1843_s12, %s1843_s12, %s1844_s13  }
 0x31f   :  { %1827 = dma.done.wait [#allocation4], 256  }
 0x320   :  { %1828 = vsyncadd [#allocation4], 4294967040 }
 0x321   :  { %1364 = vsyncpa [#allocation3], 1 }
 0x322   :  { %1365 = vsyncpa [#allocation6], 1 }
 0x323   :  { %1366 = vsyncpa [#allocation9], 1 }
 0x324   :  { %1367 = vsyncpa [#allocation4], 1 }

</bundles_post_ra>
